<compile_context>
chip_gen: v5e
topology: v5e:2x2
jax: 0.10.0
libtpu: 0.0.40
codegen_flags: <defaults>
</compile_context>

<pallas_src>
import functools

import jax
import jax.numpy as jnp
from jax.experimental import pallas as pl
from jax.experimental.pallas import tpu as pltpu


def _relu6_kernel(x_ref, o_ref):
    x = x_ref[...]
    # dtype-typed bounds: no float promotion / extra converts for integer or
    # low-precision inputs; NaN propagation matches torch.clamp.
    zero = jnp.asarray(0, dtype=x.dtype)
    six = jnp.asarray(6, dtype=x.dtype)
    o_ref[...] = jnp.minimum(jnp.maximum(x, zero), six)


def _round_up(a: int, b: int) -> int:
    return -(-a // b) * b


def _launch(x2d, block_shape, index_map, grid, vmem_limit_bytes):
    return pl.pallas_call(
        _relu6_kernel,
        out_shape=jax.ShapeDtypeStruct(x2d.shape, x2d.dtype),
        grid_spec=pltpu.PrefetchScalarGridSpec(
            num_scalar_prefetch=0,
            grid=grid,
            in_specs=[pl.BlockSpec(block_shape, index_map)],
            out_specs=pl.BlockSpec(block_shape, index_map),
        ),
        compiler_params=pltpu.CompilerParams(
            dimension_semantics=("parallel",),
            vmem_limit_bytes=vmem_limit_bytes,
        ),
    )(x2d)


_MULTICORE_BYTES = 2 << 20  # above this, force >= 2 grid steps (v7x: 2 TCs)


@functools.partial(jax.jit, static_argnames=("tile_bytes",))
def my_relu6(x: jax.Array, *, tile_bytes: int = 8 << 20) -> jax.Array:
    """Elementwise clamp(x, 0, 6), matching torch.clamp(x, min=0, max=6)."""
    orig_shape = x.shape
    dtype = x.dtype
    n = x.size
    if n == 0:
        return x

    itemsize = jnp.dtype(dtype).itemsize
    total_bytes = n * itemsize
    # Sublane packing multiple: 8 for 4-byte, 16 for 2-byte, 32 for 1-byte.
    sub = max(8, 32 // itemsize)

    # Lane width for the aligned fast path: largest multiple of 128 (<= 2048)
    # dividing n, so reshape to (rows, C) is metadata-only (no padding pass).
    C = None
    for cand in (2048, 1024, 512, 256, 128):
        if n % cand == 0:
            C = cand
            break

    if C is not None:
        # ---- aligned path: dense (rows, C) slab, row-tiled ----
        rows = n // C
        eff_tile = max(64 * 1024, min(tile_bytes, 10 << 20))
        tr = max(sub, (eff_tile // (C * itemsize)) // sub * sub)
        if total_bytes > _MULTICORE_BYTES and rows >= 2 * sub:
            # Never collapse mid-size arrays to a single step: >= 2 steps lets
            # the "parallel" axis shard across v7x's two TensorCores.
            tr = min(tr, _round_up(-(-rows // 2), sub))
        if tr >= rows:
            tr = rows  # single block == full array dims (always legal)
        grid = (pl.cdiv(rows, tr),)
        block_bytes = tr * C * itemsize
        # in + out, double-buffered, plus margin; comfortably inside v7x's
        # 64 MiB/TC VMEM and above v5e/v6e default scoped limits.
        vmem_limit = max(16 << 20, min(48 << 20, 4 * block_bytes + (4 << 20)))
        out = _launch(x.reshape(rows, C), (tr, C), lambda i: (i, 0), grid, vmem_limit)
        return out.reshape(orig_shape)

    # ---- ragged path (n not a multiple of 128) ----
    # Process the flat (1, n) view directly; the cdiv grid's ragged last block
    # is masked by Pallas, so there is no padding pass and no output slice.
    # (1, blk) blocks may be sublane-padded in VMEM, so cap the block element
    # count and budget the VMEM limit for that worst case.
    # TODO(synk): a manual-DMA (rows, 128) staging layout would recover full
    # sublane density for very large ragged inputs on v7x.
    min_blk = sub * 128
    max_blk = 262144  # worst-case padded VMEM stays ~32 MiB double-buffered
    blk = max(min_blk, (min(tile_bytes // itemsize, max_blk) // min_blk) * min_blk)
    if blk >= n:
        blk = n  # single block == full array dim (legal for any n)
    grid = (pl.cdiv(n, blk),)
    vmem_limit = max(16 << 20, min(40 << 20, 4 * 32 * blk + (4 << 20)))
    out = _launch(x.reshape(1, n), (1, blk), lambda i: (0, i), grid, vmem_limit)
    return out.reshape(orig_shape)


if __name__ == "__main__":
    key = jax.random.PRNGKey(0)
    k0, k1, k2, k3 = jax.random.split(key, 4)

    # 1) NCHW input (PyTorch convention), scaled to exercise both clamp bounds.
    x = jax.random.normal(k0, (2, 4, 16, 16), dtype=jnp.float32) * 5.0
    y = my_relu6(x)
    jax.block_until_ready(y)
    assert y.shape == x.shape and y.dtype == x.dtype
    assert jnp.allclose(y, jnp.clip(x, 0.0, 6.0)), "mismatch (aligned path)"

    # 2) Ragged element count (105) -> padding-free (1, n) path, single block.
    x_odd = jax.random.normal(k1, (3, 5, 7), dtype=jnp.float32) * 5.0
    y_odd = my_relu6(x_odd)
    jax.block_until_ready(y_odd)
    assert y_odd.shape == x_odd.shape and y_odd.dtype == x_odd.dtype
    assert jnp.allclose(y_odd, jnp.clip(x_odd, 0.0, 6.0)), "mismatch (ragged, 1 block)"

    # 3) Ragged multi-block (exercises the masked ragged last block).
    x_rag = jax.random.normal(k2, (3, 1000), dtype=jnp.float32) * 5.0
    y_rag = my_relu6(x_rag, tile_bytes=4096)
    jax.block_until_ready(y_rag)
    assert jnp.allclose(y_rag, jnp.clip(x_rag, 0.0, 6.0)), "mismatch (ragged, multi-block)"

    # 4) Aligned multi-block grid (tile_bytes override) to exercise row tiling.
    x_big = jax.random.normal(k3, (16, 8, 32, 32), dtype=jnp.float32) * 5.0
    y_big = my_relu6(x_big, tile_bytes=64 * 1024)
    jax.block_until_ready(y_big)
    assert jnp.allclose(y_big, jnp.clip(x_big, 0.0, 6.0)), "mismatch (aligned, multi-block)"

    print("KERNEL_OK")
</pallas_src>

<mosaic_0001>
module attributes {stable_mosaic.version = 11 : i64} {
  func.func @_relu6_kernel(%arg0: i32, %arg1: memref<1x2048xf32, #tpu.memory_space<vmem>>, %arg2: memref<1x2048xf32, #tpu.memory_space<vmem>>) attributes {dimension_semantics = [#tpu.dimension_semantics<parallel>], iteration_bounds = array<i64: 1>, scalar_prefetch = 0 : i64, scratch_operands = 0 : i64, tpu.core_type = #tpu.core_type<tc>, window_params = [{transform_indices = @transform_0, window_bounds = array<i64: 1, 2048>}, {transform_indices = @transform_1, window_bounds = array<i64: 1, 2048>}]} {
    %c0 = arith.constant 0 : index
    %c0_0 = arith.constant 0 : index
    %0 = vector.load %arg1[%c0, %c0_0] : memref<1x2048xf32, #tpu.memory_space<vmem>>, vector<1x2048xf32>
    %cst = arith.constant 0.000000e+00 : f32
    %1 = vector.broadcast %cst : f32 to vector<1x2048xf32>
    %2 = arith.maximumf %0, %1 : vector<1x2048xf32>
    %cst_1 = arith.constant 6.000000e+00 : f32
    %3 = vector.broadcast %cst_1 : f32 to vector<1x2048xf32>
    %4 = arith.minimumf %2, %3 : vector<1x2048xf32>
    %c0_2 = arith.constant 0 : index
    %c0_3 = arith.constant 0 : index
    %5 = vector.load %arg2[%c0_2, %c0_3] : memref<1x2048xf32, #tpu.memory_space<vmem>>, vector<1x2048xf32>
    tpu.vector_store %arg2[%c0_2, %c0_3], %4 {strides = array<i32>} : memref<1x2048xf32, #tpu.memory_space<vmem>>, vector<1x2048xf32>,
    return
  }
  func.func @transform_0(%arg0: i32) -> (i32, i32) {
    %c0_i32 = arith.constant 0 : i32
    %c0_i32_0 = arith.constant 0 : i32
    return %arg0, %c0_i32 : i32, i32
  }
  func.func @transform_1(%arg0: i32) -> (i32, i32) {
    %c0_i32 = arith.constant 0 : i32
    %c0_i32_0 = arith.constant 0 : i32
    return %arg0, %c0_i32 : i32, i32
  }
}

</mosaic_0001>

<bundles_post_ra>
// kernel: my_relu6.1
= control target key start
LH: loop header
LB: loop body
LE: loop exit
PB: predicated region body
PF: predicated region fallthrough
CT: control target
= control target key end

     0   :  { %s42_s0 = inlined_call_operand.vmem [shape: f32[1,2048], index: 0, kind: input, shape index: {}]   ;;  %s43_s1 = inlined_call_operand.vmem [shape: f32[1,2048], index: 1, kind: output, shape index: {}]  }
   0x1   :  { %v8_v0 = vld [vmem:[%s42_s0] sm:$0xff]  ;;  %v9_v1 = vld [vmem:[%s42_s0 + $0x8] sm:$0xff] }
   0x2   :  { %v10_v2 = vmax.f32 %v8_v0, 0.0  ;;  %v11_v3 = vmax.f32 %v9_v1, 0.0 }
   0x4   :  { %v12_v4 = vmin.f32 %v10_v2, 6.0  ;;  %v13_v5 = vmin.f32 %v11_v3, 6.0 }
   0x6   :  { %14 = vst [vmem:[%s43_s1] sm:$0xff] %v12_v4 }
   0x7   :  { %15 = vst [vmem:[%s43_s1 + $0x8] sm:$0xff] %v13_v5 }

</bundles_post_ra>
